<compile_context>
chip_gen: v7x
topology: tpu7x:2x2x1
jax: 0.10.0
libtpu: 0.0.40
codegen_flags: <defaults>
</compile_context>

<pallas_src>
import math
import jax
import jax.numpy as jnp
from jax.experimental import pallas as pl
from jax.experimental.pallas import tpu as pltpu


# ---------------------------------------------------------------------------
# Kernel
# ---------------------------------------------------------------------------
def _mlp_kernel(x_ref, w1_ref, b1_ref, w2_ref, b2_ref, o_ref):
    # First linear (MXU) + bias + ReLU in f32.
    h = jnp.dot(x_ref[...], w1_ref[...], preferred_element_type=jnp.float32)
    h = jnp.maximum(h + b1_ref[...], 0.0)
    # Second linear (MXU); cast activations back to the weight dtype so a
    # bf16 compute_dtype keeps the MXU inputs in bf16 (no-op for f32).
    z = jnp.dot(h.astype(w2_ref.dtype), w2_ref[...],
                preferred_element_type=jnp.float32)
    o_ref[...] = (z + b2_ref[...]).astype(o_ref.dtype)


# ---------------------------------------------------------------------------
# Helpers
# ---------------------------------------------------------------------------
def _round_up(x, m):
    return -(-x // m) * m


def _choose_pack(meta_dim, hidden_dim, z_dim, max_p=64):
    """Smallest power-of-two P making P*z_dim a multiple of 128 (lane-dense
    output stores), grown a little so the matmul K dims also reach 128 lanes,
    while keeping the block-diagonal weights small."""
    p = 1
    while (p * z_dim) % 128 != 0 and p < max_p:
        p *= 2
    if (p * z_dim) % 128 != 0:
        return 1  # fall back to no packing (still correct, just masked stores)

    def weight_bytes(q):
        return 4 * q * q * (meta_dim * hidden_dim + hidden_dim * z_dim)

    while (p < max_p
           and p * min(meta_dim, hidden_dim) < 128
           and weight_bytes(2 * p) <= (8 << 20)):
        p *= 2
    return p


def prepare_meta_embedding_params(params, *, compute_dtype=jnp.float32):
    """One-time (init-time) preprocessing: block-diagonal weight packing,
    bias tiling, dtype casts.  Keeps the per-call hot path free of weight ops."""
    w1 = jnp.asarray(params["w1"], jnp.float32)
    b1 = jnp.asarray(params["b1"], jnp.float32)
    w2 = jnp.asarray(params["w2"], jnp.float32)
    b2 = jnp.asarray(params["b2"], jnp.float32)

    meta_dim, hidden_dim = w1.shape
    z_dim = w2.shape[1]
    pack = _choose_pack(meta_dim, hidden_dim, z_dim)

    eye = jnp.eye(pack, dtype=jnp.float32)
    w1_bd = jnp.kron(eye, w1).astype(compute_dtype)          # (P*meta, P*hidden)
    w2_bd = jnp.kron(eye, w2).astype(compute_dtype)          # (P*hidden, P*z)
    b1_t = jnp.tile(b1, pack).reshape(1, pack * hidden_dim)  # f32, (1, P*hidden)
    b2_t = jnp.tile(b2, pack).reshape(1, pack * z_dim)       # f32, (1, P*z)

    return {
        "w1": w1_bd, "b1": b1_t, "w2": w2_bd, "b2": b2_t,
        "pack": pack, "meta_dim": meta_dim, "hidden_dim": hidden_dim,
        "z_dim": z_dim, "compute_dtype": compute_dtype,
    }


# ---------------------------------------------------------------------------
# Forward
# ---------------------------------------------------------------------------
def meta_embedding_forward(meta_v, prepared, *, block_rows=None):
    """Pallas forward of Meta_Embadding.

    meta_v   : (..., meta_dim) array
    prepared : output of prepare_meta_embedding_params()
    returns  : (-1, z_dim) float32  (matches .view(-1, z_dim) in PyTorch)
    """
    pack = prepared["pack"]
    meta_dim = prepared["meta_dim"]
    z_dim = prepared["z_dim"]
    cdt = prepared["compute_dtype"]

    x = meta_v.reshape(-1, meta_dim).astype(cdt)
    B = x.shape[0]

    # Packed-row count and batch tile (rows of packed width).
    rows = -(-B // pack)
    if block_rows is None:
        tb = min(1024, _round_up(rows, 8))   # big tile -> pipelined, multi-step grid
    else:
        tb = _round_up(block_rows, 8)
    tb = max(tb, 8)

    rows_pad = _round_up(rows, tb)
    b_pad = rows_pad * pack
    if b_pad != B:
        x = jnp.pad(x, ((0, b_pad - B), (0, 0)))
    x_packed = x.reshape(rows_pad, pack * meta_dim)

    grid = (rows_pad // tb,)
    out = pl.pallas_call(
        _mlp_kernel,
        out_shape=jax.ShapeDtypeStruct((rows_pad, pack * z_dim), jnp.float32),
        grid_spec=pltpu.PrefetchScalarGridSpec(
            num_scalar_prefetch=0,
            grid=grid,
            in_specs=[
                pl.BlockSpec((tb, pack * meta_dim), lambda i: (i, 0)),   # x tile
                pl.BlockSpec(prepared["w1"].shape, lambda i: (0, 0)),    # W1 (resident)
                pl.BlockSpec(prepared["b1"].shape, lambda i: (0, 0)),    # b1
                pl.BlockSpec(prepared["w2"].shape, lambda i: (0, 0)),    # W2 (resident)
                pl.BlockSpec(prepared["b2"].shape, lambda i: (0, 0)),    # b2
            ],
            out_specs=pl.BlockSpec((tb, pack * z_dim), lambda i: (i, 0)),
        ),
        compiler_params=pltpu.CompilerParams(
            dimension_semantics=("parallel",),
        ),
    )(x_packed, prepared["w1"], prepared["b1"], prepared["w2"], prepared["b2"])

    # Unpack lane-dense output back to (B, z_dim) — a free contiguous reshape.
    return out.reshape(b_pad, z_dim)[:B]


# ---------------------------------------------------------------------------
# Parameter init (matches the PyTorch module's init_layers)
# ---------------------------------------------------------------------------
def init_meta_embedding_params(key, meta_dim, hidden_dim=128, z_dim=128):
    """weights ~ U(-1/sqrt(2*fan_in), 1/sqrt(2*fan_in));
       biases keep PyTorch's default Linear init U(-1/sqrt(fan_in), 1/sqrt(fan_in))."""
    k1, k2, k3, k4 = jax.random.split(key, 4)

    bound1 = 1.0 / math.sqrt(2 * meta_dim)
    w1 = jax.random.uniform(k1, (meta_dim, hidden_dim), jnp.float32, -bound1, bound1)
    bb1 = 1.0 / math.sqrt(meta_dim)
    b1 = jax.random.uniform(k2, (hidden_dim,), jnp.float32, -bb1, bb1)

    bound2 = 1.0 / math.sqrt(2 * hidden_dim)
    w2 = jax.random.uniform(k3, (hidden_dim, z_dim), jnp.float32, -bound2, bound2)
    bb2 = 1.0 / math.sqrt(hidden_dim)
    b2 = jax.random.uniform(k4, (z_dim,), jnp.float32, -bb2, bb2)

    return {"w1": w1, "b1": b1, "w2": w2, "b2": b2}


def _reference_forward(meta_v, params):
    x = meta_v.reshape(-1, params["w1"].shape[0])
    h = jnp.maximum(x @ params["w1"] + params["b1"], 0.0)
    return h @ params["w2"] + params["b2"]


if __name__ == "__main__":
    key = jax.random.PRNGKey(0)
    k_param, k_in = jax.random.split(key)

    # Small shapes consistent with the module's forward.
    meta_dim, hidden_dim, z_dim = 16, 32, 32
    batch = 8

    params = init_meta_embedding_params(k_param, meta_dim, hidden_dim, z_dim)
    # One-time preprocessing (lane-density packing, dtype casts) — hot path only
    # touches meta_v.  Use compute_dtype=jnp.bfloat16 on v6e/v7x if the
    # precision trade-off is acceptable; f32 here for PyTorch parity.
    prepared = prepare_meta_embedding_params(params, compute_dtype=jnp.float32)

    meta_v = jax.random.normal(k_in, (batch, meta_dim), jnp.float32)

    z = meta_embedding_forward(meta_v, prepared)
    z = jax.block_until_ready(z)

    z_ref = _reference_forward(meta_v, params)
    assert z.shape == (batch, z_dim)
    assert jnp.allclose(z, z_ref, atol=1e-5, rtol=1e-5), "mismatch vs reference"

    # Also exercise a ragged batch (no divisibility assert anymore).
    meta_v2 = jax.random.normal(jax.random.PRNGKey(1), (13, meta_dim), jnp.float32)
    z2 = jax.block_until_ready(meta_embedding_forward(meta_v2, prepared))
    z2_ref = _reference_forward(meta_v2, params)
    assert z2.shape == (13, z_dim)
    assert jnp.allclose(z2, z2_ref, atol=1e-5, rtol=1e-5), "ragged mismatch"

    print("KERNEL_OK")
</pallas_src>

<mosaic_0001>
module attributes {stable_mosaic.version = 11 : i64} {
  func.func @_mlp_kernel(%arg0: i32, %arg1: memref<8x128xf32, #tpu.memory_space<vmem>>, %arg2: memref<128x256xf32, #tpu.memory_space<vmem>>, %arg3: memref<1x256xf32, #tpu.memory_space<vmem>>, %arg4: memref<256x256xf32, #tpu.memory_space<vmem>>, %arg5: memref<1x256xf32, #tpu.memory_space<vmem>>, %arg6: memref<8x256xf32, #tpu.memory_space<vmem>>) attributes {dimension_semantics = [#tpu.dimension_semantics<parallel>], iteration_bounds = array<i64: 1>, scalar_prefetch = 0 : i64, scratch_operands = 0 : i64, tpu.core_type = #tpu.core_type<tc>, window_params = [{transform_indices = @transform_0, window_bounds = array<i64: 8, 128>}, {pipeline_mode = #tpu.pipeline_mode<synchronous>, transform_indices = @transform_1, window_bounds = array<i64: 128, 256>}, {pipeline_mode = #tpu.pipeline_mode<synchronous>, transform_indices = @transform_2, window_bounds = array<i64: 1, 256>}, {pipeline_mode = #tpu.pipeline_mode<synchronous>, transform_indices = @transform_3, window_bounds = array<i64: 256, 256>}, {pipeline_mode = #tpu.pipeline_mode<synchronous>, transform_indices = @transform_4, window_bounds = array<i64: 1, 256>}, {transform_indices = @transform_5, window_bounds = array<i64: 8, 256>}]} {
    %c0 = arith.constant 0 : index
    %c0_0 = arith.constant 0 : index
    %0 = vector.load %arg1[%c0, %c0_0] : memref<8x128xf32, #tpu.memory_space<vmem>>, vector<8x128xf32>
    %c0_1 = arith.constant 0 : index
    %c0_2 = arith.constant 0 : index
    %1 = vector.load %arg2[%c0_1, %c0_2] : memref<128x256xf32, #tpu.memory_space<vmem>>, vector<128x256xf32>
    %cst = arith.constant dense<0.000000e+00> : vector<8x256xf32>
    %2 = tpu.matmul %0, %1, %cst {dimension_numbers = #tpu.dot_dimension_numbers<[1], [0], [0], [1], [0, 0, 1, 1], [], []>} : vector<8x128xf32>, vector<128x256xf32>, vector<8x256xf32> -> vector<8x256xf32>
    %c0_3 = arith.constant 0 : index
    %c0_4 = arith.constant 0 : index
    %3 = vector.load %arg3[%c0_3, %c0_4] : memref<1x256xf32, #tpu.memory_space<vmem>>, vector<1x256xf32>
    %4 = vector.broadcast %3 : vector<1x256xf32> to vector<8x256xf32>
    %5 = arith.addf %2, %4 : vector<8x256xf32>
    %cst_5 = arith.constant 0.000000e+00 : f32
    %6 = vector.broadcast %cst_5 : f32 to vector<8x256xf32>
    %7 = arith.maximumf %5, %6 : vector<8x256xf32>
    %c0_6 = arith.constant 0 : index
    %c0_7 = arith.constant 0 : index
    %8 = vector.load %arg4[%c0_6, %c0_7] : memref<256x256xf32, #tpu.memory_space<vmem>>, vector<256x256xf32>
    %cst_8 = arith.constant dense<0.000000e+00> : vector<8x256xf32>
    %9 = tpu.matmul %7, %8, %cst_8 {dimension_numbers = #tpu.dot_dimension_numbers<[1], [0], [0], [1], [0, 0, 1, 1], [], []>} : vector<8x256xf32>, vector<256x256xf32>, vector<8x256xf32> -> vector<8x256xf32>
    %c0_9 = arith.constant 0 : index
    %c0_10 = arith.constant 0 : index
    %10 = vector.load %arg5[%c0_9, %c0_10] : memref<1x256xf32, #tpu.memory_space<vmem>>, vector<1x256xf32>
    %11 = vector.broadcast %10 : vector<1x256xf32> to vector<8x256xf32>
    %12 = arith.addf %9, %11 : vector<8x256xf32>
    %c0_11 = arith.constant 0 : index
    %c0_12 = arith.constant 0 : index
    %13 = vector.load %arg6[%c0_11, %c0_12] : memref<8x256xf32, #tpu.memory_space<vmem>>, vector<8x256xf32>
    tpu.vector_store %arg6[%c0_11, %c0_12], %12 {strides = array<i32>} : memref<8x256xf32, #tpu.memory_space<vmem>>, vector<8x256xf32>,
    return
  }
  func.func @transform_0(%arg0: i32) -> (i32, i32) {
    %c0_i32 = arith.constant 0 : i32
    %c0_i32_0 = arith.constant 0 : i32
    return %arg0, %c0_i32 : i32, i32
  }
  func.func @transform_1(%arg0: i32) -> (i32, i32) {
    %c0_i32 = arith.constant 0 : i32
    %c0_i32_0 = arith.constant 0 : i32
    %c0_i32_1 = arith.constant 0 : i32
    return %c0_i32, %c0_i32_0 : i32, i32
  }
  func.func @transform_2(%arg0: i32) -> (i32, i32) {
    %c0_i32 = arith.constant 0 : i32
    %c0_i32_0 = arith.constant 0 : i32
    %c0_i32_1 = arith.constant 0 : i32
    return %c0_i32, %c0_i32_0 : i32, i32
  }
  func.func @transform_3(%arg0: i32) -> (i32, i32) {
    %c0_i32 = arith.constant 0 : i32
    %c0_i32_0 = arith.constant 0 : i32
    %c0_i32_1 = arith.constant 0 : i32
    return %c0_i32, %c0_i32_0 : i32, i32
  }
  func.func @transform_4(%arg0: i32) -> (i32, i32) {
    %c0_i32 = arith.constant 0 : i32
    %c0_i32_0 = arith.constant 0 : i32
    %c0_i32_1 = arith.constant 0 : i32
    return %c0_i32, %c0_i32_0 : i32, i32
  }
  func.func @transform_5(%arg0: i32) -> (i32, i32) {
    %c0_i32 = arith.constant 0 : i32
    %c0_i32_0 = arith.constant 0 : i32
    return %arg0, %c0_i32 : i32, i32
  }
}

</mosaic_0001>

<bundles_post_ra>
// kernel: tpu_custom_call.1
= control target key start
LH: loop header
LB: loop body
LE: loop exit
PB: predicated region body
PF: predicated region fallthrough
CT: control target
= control target key end

     0   :  { %10 = vsyncpa [#allocation3], 0  ;;  %s637_s0 = inlined_call_operand.hbm [shape: f32[8,128], index: 0, kind: input, shape index: {}]   ;;  %s638_s1 = inlined_call_operand.hbm [shape: f32[128,256], index: 1, kind: input, shape index: {}]   ;;  %s639_s2 = inlined_call_operand.vmem [shape: f32[1,256], index: 2, kind: input, shape index: {}]   ;;  %s640_s3 = inlined_call_operand.hbm [shape: f32[256,256], index: 3, kind: input, shape index: {}]   ;;  %s641_s4 = inlined_call_operand.vmem [shape: f32[1,256], index: 4, kind: input, shape index: {}]   ;;  %s642_s5 = inlined_call_operand.hbm [shape: f32[8,256], index: 5, kind: output, shape index: {}]  }
   0x1   :  { %11 = vsyncpa [#allocation6], 0 }
   0x2   :  { %12 = vsyncpa [#allocation4], 0  ;;  %s540_s18 = smov [#allocation5]   ;;  %s446_s22 = scalar_lea.hbm %s638_s1, 4096 }
   0x3   :  { %s28_s19 = sshll.u32 %s540_s18, 4  ;;  %p447_p0 = scmp.ne.s32.totalorder %s638_s1, %s446_s22  ;;  %s29_s19 = int_to_ptr.vmem [resolvable:$true] %s28_s19 }
   0x4   :  { %p450_p1 = scmp.lt.u32.totalorder %s446_s22, %s638_s1 }
   0x6   :  { %p452_p2 = pnand %p450_p1, %p447_p0 }
   0x8   :  { %455 = shalt.err (!%p452_p2)
}
   0x9   :  { %s456_s27 = scalar_lea.vmem %s29_s19, 4096  ;;  %p461_p4 = scmp.lt.s32.totalorder %s29_s19, %s29_s19 }
   0xa   :  { %p457_p3 = scmp.ne.s32.totalorder %s29_s19, %s456_s27  ;;  %p462_p5 = scmp.lt.s32.totalorder %s456_s27, %s456_s27 }
   0xc   :  { %p463_p6 = por %p462_p5, %p461_p4 }
   0xe   :  { %p464_p7 = pnand %p463_p6, %p457_p3 }
  0x10   :  { %467 = shalt.err (!%p464_p7)
}
  0x11   :  { %s541_s28 = smov 256   ;;  %s542_s29 = smov 16  }
  0x12   :  { %34 = dma.hbm_to_vmem [thread:$0]  %s638_s1, 4096, %s29_s19, [#allocation6], %s541_s28, %s541_s28, %s542_s29  }
  0x13   :  { %s543_s7 = smov [#allocation2]   ;;  %s544_s9 = smov [#allocation7]  }
  0x14   :  { %s19_s8 = sshll.u32 %s543_s7, 4  ;;  %s42_s10 = sshll.u32 %s544_s9, 4  ;;  %s20_s8 = int_to_ptr.vmem [resolvable:$true] %s19_s8  ;;  %s43_s10 = int_to_ptr.vmem [resolvable:$true] %s42_s10 }
  0x15   :  { %s468_s13 = scalar_lea.hbm %s637_s0, 128 }
  0x16   :  { %p469_p8 = scmp.ne.s32.totalorder %s637_s0, %s468_s13  ;;  %p472_p9 = scmp.lt.u32.totalorder %s468_s13, %s637_s0 }
  0x18   :  { %p474_p10 = pnand %p472_p9, %p469_p8 }
  0x1a   :  { %477 = shalt.err (!%p474_p10)
}
  0x1b   :  { %s478_s1 = scalar_lea.vmem %s20_s8, 128  ;;  %p483_p12 = scmp.lt.s32.totalorder %s20_s8, %s20_s8 }
  0x1c   :  { %p479_p11 = scmp.ne.s32.totalorder %s20_s8, %s478_s1  ;;  %p484_p13 = scmp.lt.s32.totalorder %s478_s1, %s478_s1 }
  0x1e   :  { %p485_p0 = por %p484_p13, %p483_p12 }
  0x20   :  { %p486_p1 = pnand %p485_p0, %p479_p11 }
  0x22   :  { %489 = shalt.err (!%p486_p1)
}
  0x23   :  { %22 = dma.hbm_to_vmem [thread:$0]  %s637_s0, 128, %s20_s8, [#allocation3]  }
  0x24   :  { %s490_s22 = scalar_lea.hbm %s640_s3, 8192 }
  0x25   :  { %p491_p2 = scmp.ne.s32.totalorder %s640_s3, %s490_s22  ;;  %p494_p3 = scmp.lt.u32.totalorder %s490_s22, %s640_s3 }
  0x27   :  { %p496_p4 = pnand %p494_p3, %p491_p2 }
  0x29   :  { %499 = shalt.err (!%p496_p4)
}
  0x2a   :  { %s500_s27 = scalar_lea.vmem %s43_s10, 8192  ;;  %p505_p6 = scmp.lt.s32.totalorder %s43_s10, %s43_s10 }
  0x2b   :  { %p501_p5 = scmp.ne.s32.totalorder %s43_s10, %s500_s27  ;;  %p506_p7 = scmp.lt.s32.totalorder %s500_s27, %s500_s27 }
  0x2d   :  { %p507_p8 = por %p506_p7, %p505_p6 }
  0x2f   :  { %p508_p9 = pnand %p507_p8, %p501_p5 }
  0x31   :  { %511 = shalt.err (!%p508_p9)
}
  0x32   :  { %48 = dma.hbm_to_vmem [thread:$0]  %s640_s3, 8192, %s43_s10, [#allocation6], %s541_s28, %s541_s28, %s542_s29  }
  0x33   :  { %534 = dma.done.wait [#allocation3], 128  }
  0x34   :  { %535 = vsyncadd [#allocation3], 4294967168 }
  0x35   :  { %536 = dma.done.wait [#allocation6], 12288  }
  0x36   :  { %537 = vsyncadd [#allocation6], 4294955008  ;;  %v545_v0 = vmov 0.0   ;;  %v62_v1 = vld [vmem:[#allocation5 + $0x8] sm:$0xff]  ;;  %v64_v2 = vld [vmem:[#allocation5 + $0x18] sm:$0xff]  ;;  %s546_s7 = smov [#allocation8]  }
  0x37   :  { %169 = vmatprep.mubr.f32.mxu0 %v545_v0  ;;  %v61_v3 = vld [vmem:[#allocation5] sm:$0xff]  ;;  %v343_v4 = vpack.c.bf16 %v64_v2, %v62_v1  ;;  %v63_v5 = vld [vmem:[#allocation5 + $0x10] sm:$0xff]  ;;  %v66_v6 = vld [vmem:[#allocation5 + $0x28] sm:$0xff]  ;;  %s333_s8 = sshll.u32 %s546_s7, 4  ;;  %s334_s8 = int_to_ptr.vmem [resolvable:$true] %s333_s8 }
  0x38   :  { %v68_v7 = vld [vmem:[#allocation5 + $0x38] sm:$0xff]  ;;  %v345_v8 = vpack.c.bf16 %v63_v5, %v61_v3  ;;  %v65_v10 = vld [vmem:[#allocation5 + $0x20] sm:$0xff]  ;;  %v67_v11 = vld [vmem:[#allocation5 + $0x30] sm:$0xff]  ;;  %p517_p11 = scmp.lt.s32.totalorder %s334_s8, %s334_s8 }
  0x39   :  { %v347_v9 = vpack.c.bf16 %v68_v7, %v66_v6  ;;  %v70_v12 = vld [vmem:[#allocation5 + $0x48] sm:$0xff]  ;;  %344 = vmatprep.subr.bf16.mxu0 %v343_v4  ;;  %v72_v13 = vld [vmem:[#allocation5 + $0x58] sm:$0xff]  ;;  %v349_v14 = vpack.c.bf16 %v67_v11, %v65_v10  ;;  %v69_v16 = vld [vmem:[#allocation5 + $0x40] sm:$0xff] }
  0x3a   :  { %346 = vmatpush1.bf16.msra.mxu0 %v345_v8  ;;  %v351_v15 = vpack.c.bf16 %v72_v13, %v70_v12  ;;  %v71_v17 = vld [vmem:[#allocation5 + $0x50] sm:$0xff]  ;;  %v74_v18 = vld [vmem:[#allocation5 + $0x68] sm:$0xff]  ;;  %v76_v19 = vld [vmem:[#allocation5 + $0x78] sm:$0xff] }
  0x3b   :  { %348 = vmatprep.subr.bf16.mxu0 %v347_v9  ;;  %v353_v20 = vpack.c.bf16 %v71_v17, %v69_v16  ;;  %v355_v21 = vpack.c.bf16 %v76_v19, %v74_v18  ;;  %v73_v22 = vld [vmem:[#allocation5 + $0x60] sm:$0xff]  ;;  %v75_v23 = vld [vmem:[#allocation5 + $0x70] sm:$0xff]  ;;  %v78_v24 = vld [vmem:[#allocation5 + $0x88] sm:$0xff] }
  0x3c   :  { %v80_v25 = vld [vmem:[#allocation5 + $0x98] sm:$0xff]  ;;  %v77_v26 = vld [vmem:[#allocation5 + $0x80] sm:$0xff]  ;;  %v79_v27 = vld [vmem:[#allocation5 + $0x90] sm:$0xff]  ;;  %v357_v31 = vpack.c.bf16 %v75_v23, %v73_v22 }
  0x3d   :  { %v179_v28 = vld [vmem:[#allocation7 + $0x8] sm:$0xff]  ;;  %v181_v29 = vld [vmem:[#allocation7 + $0x18] sm:$0xff]  ;;  %v178_v30 = vld [vmem:[#allocation7] sm:$0xff]  ;;  %v359_v36 = vpack.c.bf16 %v80_v25, %v78_v24  ;;  %v361_v46 = vpack.c.bf16 %v79_v27, %v77_v26 }
  0x3e   :  { %350 = vmatpush1.bf16.msra.mxu0 %v349_v14  ;;  %v375_v32 = vpack.c.bf16 %v181_v29, %v179_v28  ;;  %v180_v33 = vld [vmem:[#allocation7 + $0x10] sm:$0xff]  ;;  %v183_v34 = vld [vmem:[#allocation7 + $0x28] sm:$0xff]  ;;  %v185_v35 = vld [vmem:[#allocation7 + $0x38] sm:$0xff] }
  0x3f   :  { %352 = vmatprep.subr.bf16.mxu0 %v351_v15  ;;  %v377_v37 = vpack.c.bf16 %v180_v33, %v178_v30  ;;  %v379_v38 = vpack.c.bf16 %v185_v35, %v183_v34  ;;  %v182_v39 = vld [vmem:[#allocation7 + $0x20] sm:$0xff]  ;;  %v184_v40 = vld [vmem:[#allocation7 + $0x30] sm:$0xff]  ;;  %v187_v41 = vld [vmem:[#allocation7 + $0x48] sm:$0xff] }
  0x40   :  { %v82_v42 = vld [vmem:[#allocation5 + $0xa8] sm:$0xff]  ;;  %v84_v43 = vld [vmem:[#allocation5 + $0xb8] sm:$0xff]  ;;  %376 = vmatprep.subr.bf16.mxu1 %v375_v32  ;;  %v381_v45 = vpack.c.bf16 %v184_v40, %v182_v39  ;;  %v81_v47 = vld [vmem:[#allocation5 + $0xa0] sm:$0xff] }
  0x41   :  { %v189_v44 = vld [vmem:[#allocation7 + $0x58] sm:$0xff]  ;;  %378 = vmatpush1.bf16.msra.mxu1 %v377_v37  ;;  %v186_v49 = vld [vmem:[#allocation7 + $0x40] sm:$0xff]  ;;  %v188_v50 = vld [vmem:[#allocation7 + $0x50] sm:$0xff]  ;;  %v363_v51 = vpack.c.bf16 %v84_v43, %v82_v42 }
  0x42   :  { %354 = vmatpush1.bf16.msra.mxu0 %v353_v20  ;;  %380 = vmatprep.subr.bf16.mxu1 %v379_v38  ;;  %v383_v48 = vpack.c.bf16 %v189_v44, %v187_v41  ;;  %v83_v52 = vld [vmem:[#allocation5 + $0xb0] sm:$0xff]  ;;  %v191_v53 = vld [vmem:[#allocation7 + $0x68] sm:$0xff]  ;;  %v193_v54 = vld [vmem:[#allocation7 + $0x78] sm:$0xff]  ;;  %v385_v57 = vpack.c.bf16 %v188_v50, %v186_v49 }
  0x43   :  { %356 = vmatprep.subr.bf16.mxu0 %v355_v21  ;;  %v86_v55 = vld [vmem:[#allocation5 + $0xc8] sm:$0xff]  ;;  %v88_v56 = vld [vmem:[#allocation5 + $0xd8] sm:$0xff]  ;;  %v365_v58 = vpack.c.bf16 %v83_v52, %v81_v47  ;;  %v85_v59 = vld [vmem:[#allocation5 + $0xc0] sm:$0xff]  ;;  %v387_v60 = vpack.c.bf16 %v193_v54, %v191_v53 }
  0x44   :  { %v190_v61 = vld [vmem:[#allocation7 + $0x60] sm:$0xff]  ;;  %v192_v62 = vld [vmem:[#allocation7 + $0x70] sm:$0xff]  ;;  %v367_v63 = vpack.c.bf16 %v88_v56, %v86_v55  ;;  %v195_v1 = vld [vmem:[#allocation7 + $0x88] sm:$0xff] }
  0x45   :  { %382 = vmatpush1.bf16.msra.mxu1 %v381_v45  ;;  %v87_v0 = vld [vmem:[#allocation5 + $0xd0] sm:$0xff]  ;;  %v197_v2 = vld [vmem:[#allocation7 + $0x98] sm:$0xff]  ;;  %v90_v3 = vld [vmem:[#allocation5 + $0xe8] sm:$0xff]  ;;  %v389_v5 = vpack.c.bf16 %v192_v62, %v190_v61 }
  0x46   :  { %358 = vmatpush1.bf16.msra.mxu0 %v357_v31  ;;  %384 = vmatprep.subr.bf16.mxu1 %v383_v48  ;;  %v92_v4 = vld [vmem:[#allocation5 + $0xf8] sm:$0xff]  ;;  %v369_v6 = vpack.c.bf16 %v87_v0, %v85_v59  ;;  %v89_v7 = vld [vmem:[#allocation5 + $0xe0] sm:$0xff]  ;;  %v391_v8 = vpack.c.bf16 %v197_v2, %v195_v1  ;;  %v196_v10 = vld [vmem:[#allocation7 + $0x90] sm:$0xff] }
  0x47   :  { %360 = vmatprep.subr.bf16.mxu0 %v359_v36  ;;  %v194_v9 = vld [vmem:[#allocation7 + $0x80] sm:$0xff]  ;;  %v371_v11 = vpack.c.bf16 %v92_v4, %v90_v3  ;;  %v91_v12 = vld [vmem:[#allocation5 + $0xf0] sm:$0xff]  ;;  %v199_v13 = vld [vmem:[#allocation7 + $0xa8] sm:$0xff] }
  0x48   :  { %v201_v14 = vld [vmem:[#allocation7 + $0xb8] sm:$0xff]  ;;  %v393_v15 = vpack.c.bf16 %v196_v10, %v194_v9  ;;  %v373_v16 = vpack.c.bf16 %v91_v12, %v89_v7  ;;  %v198_v18 = vld [vmem:[#allocation7 + $0xa0] sm:$0xff]  ;;  %v200_v19 = vld [vmem:[#allocation7 + $0xb0] sm:$0xff] }
  0x49   :  { %386 = vmatpush1.bf16.msra.mxu1 %v385_v57  ;;  %v395_v17 = vpack.c.bf16 %v201_v14, %v199_v13  ;;  %v203_v20 = vld [vmem:[#allocation7 + $0xc8] sm:$0xff]  ;;  %v205_v21 = vld [vmem:[#allocation7 + $0xd8] sm:$0xff]  ;;  %v397_v22 = vpack.c.bf16 %v200_v19, %v198_v18  ;;  %v202_v25 = vld [vmem:[#allocation7 + $0xc0] sm:$0xff]  ;;  %v95_v18 = vlaneseq }
  0x4a   :  { %362 = vmatpush1.bf16.msra.mxu0 %v361_v46  ;;  %388 = vmatprep.subr.bf16.mxu1 %v387_v60  ;;  %v60_v23 = vld [vmem:[#allocation2] sm:$0xff]  ;;  %v399_v24 = vpack.c.bf16 %v205_v21, %v203_v20  ;;  %v204_v26 = vld [vmem:[#allocation7 + $0xd0] sm:$0xff]  ;;  %v207_v27 = vld [vmem:[#allocation7 + $0xe8] sm:$0xff] }
  0x4b   :  { %364 = vmatprep.subr.bf16.mxu0 %v363_v51  ;;  %v209_v28 = vld [vmem:[#allocation7 + $0xf8] sm:$0xff]  ;;  %v401_v29 = vpack.c.bf16 %v204_v26, %v202_v25  ;;  %v206_v31 = vld [vmem:[#allocation7 + $0xe0] sm:$0xff]  ;;  %v208_v32 = vld [vmem:[#allocation7 + $0xf0] sm:$0xff]  ;;  %v96_v19 = vshrl.u32 %v95_v18, 7 }
  0x4c   :  { %v403_v30 = vpack.c.bf16 %v209_v28, %v207_v27  ;;  %v211_v33 = vld [vmem:[#allocation7 + $0x108] sm:$0xff]  ;;  %v213_v34 = vld [vmem:[#allocation7 + $0x118] sm:$0xff]  ;;  %v405_v35 = vpack.c.bf16 %v208_v32, %v206_v31  ;;  %v210_v37 = vld [vmem:[#allocation7 + $0x100] sm:$0xff] }
  0x4d   :  { %390 = vmatpush1.bf16.msra.mxu1 %v389_v5  ;;  %v407_v36 = vpack.c.bf16 %v213_v34, %v211_v33  ;;  %v212_v38 = vld [vmem:[#allocation7 + $0x110] sm:$0xff]  ;;  %v215_v39 = vld [vmem:[#allocation7 + $0x128] sm:$0xff]  ;;  %v217_v40 = vld [vmem:[#allocation7 + $0x138] sm:$0xff]  ;;  %v97_v20 = vsub.s32 0, %v96_v19 }
  0x4e   :  { %366 = vmatpush1.bf16.msra.mxu0 %v365_v58  ;;  %392 = vmatprep.subr.bf16.mxu1 %v391_v8  ;;  %v409_v41 = vpack.c.bf16 %v212_v38, %v210_v37  ;;  %v411_v42 = vpack.c.bf16 %v217_v40, %v215_v39  ;;  %v214_v43 = vld [vmem:[#allocation7 + $0x120] sm:$0xff]  ;;  %v216_v44 = vld [vmem:[#allocation7 + $0x130] sm:$0xff]  ;;  %v219_v45 = vld [vmem:[#allocation7 + $0x148] sm:$0xff] }
  0x4f   :  { %368 = vmatprep.subr.bf16.mxu0 %v367_v63  ;;  %v221_v46 = vld [vmem:[#allocation7 + $0x158] sm:$0xff]  ;;  %v413_v47 = vpack.c.bf16 %v216_v44, %v214_v43  ;;  %v218_v49 = vld [vmem:[#allocation7 + $0x140] sm:$0xff]  ;;  %v220_v50 = vld [vmem:[#allocation7 + $0x150] sm:$0xff] }
  0x50   :  { %v415_v48 = vpack.c.bf16 %v221_v46, %v219_v45  ;;  %v223_v51 = vld [vmem:[#allocation7 + $0x168] sm:$0xff]  ;;  %v225_v52 = vld [vmem:[#allocation7 + $0x178] sm:$0xff]  ;;  %v417_v53 = vpack.c.bf16 %v220_v50, %v218_v49  ;;  %v222_v55 = vld [vmem:[#allocation7 + $0x160] sm:$0xff] }
  0x51   :  { %394 = vmatpush1.bf16.msra.mxu1 %v393_v15  ;;  %v419_v54 = vpack.c.bf16 %v225_v52, %v223_v51  ;;  %v224_v56 = vld [vmem:[#allocation7 + $0x170] sm:$0xff]  ;;  %v227_v57 = vld [vmem:[#allocation7 + $0x188] sm:$0xff]  ;;  %v229_v58 = vld [vmem:[#allocation7 + $0x198] sm:$0xff] }
  0x52   :  { %370 = vmatpush1.bf16.msra.mxu0 %v369_v6  ;;  %396 = vmatprep.subr.bf16.mxu1 %v395_v17  ;;  %v421_v59 = vpack.c.bf16 %v224_v56, %v222_v55  ;;  %v423_v60 = vpack.c.bf16 %v229_v58, %v227_v57  ;;  %v226_v61 = vld [vmem:[#allocation7 + $0x180] sm:$0xff]  ;;  %v228_v62 = vld [vmem:[#allocation7 + $0x190] sm:$0xff]  ;;  %v231_v63 = vld [vmem:[#allocation7 + $0x1a8] sm:$0xff] }
  0x53   :  { %372 = vmatprep.subr.bf16.mxu0 %v371_v11  ;;  %v233_v0 = vld [vmem:[#allocation7 + $0x1b8] sm:$0xff]  ;;  %v425_v1 = vpack.c.bf16 %v228_v62, %v226_v61  ;;  %v230_v3 = vld [vmem:[#allocation7 + $0x1a0] sm:$0xff]  ;;  %v232_v4 = vld [vmem:[#allocation7 + $0x1b0] sm:$0xff] }
  0x54   :  { %v427_v2 = vpack.c.bf16 %v233_v0, %v231_v63  ;;  %v235_v5 = vld [vmem:[#allocation7 + $0x1c8] sm:$0xff]  ;;  %v237_v6 = vld [vmem:[#allocation7 + $0x1d8] sm:$0xff]  ;;  %v429_v7 = vpack.c.bf16 %v232_v4, %v230_v3  ;;  %v234_v9 = vld [vmem:[#allocation7 + $0x1c0] sm:$0xff] }
  0x55   :  { %398 = vmatpush1.bf16.msra.mxu1 %v397_v22  ;;  %v431_v8 = vpack.c.bf16 %v237_v6, %v235_v5  ;;  %v236_v10 = vld [vmem:[#allocation7 + $0x1d0] sm:$0xff]  ;;  %v239_v12 = vld [vmem:[#allocation7 + $0x1e8] sm:$0xff]  ;;  %v241_v13 = vld [vmem:[#allocation7 + $0x1f8] sm:$0xff]  ;;  %v101_v22 = vsub.s32 1, %v96_v19 }
  0x56   :  { %374 = vmatpush1.bf16.msra.mxu0 %v373_v16  ;;  %400 = vmatprep.subr.bf16.mxu1 %v399_v24  ;;  %v433_v11 = vpack.c.bf16 %v236_v10, %v234_v9  ;;  %v435_v14 = vpack.c.bf16 %v241_v13, %v239_v12  ;;  %v238_v15 = vld [vmem:[#allocation7 + $0x1e0] sm:$0xff]  ;;  %v240_v16 = vld [vmem:[#allocation7 + $0x1f0] sm:$0xff]  ;;  %v93_v21 = vld [vmem:[%s639_s2] sm:$0x3]  ;;  %s512_s2 = scalar_lea.vmem %s334_s8, 256 }
  0x57   :  { %v437_v17 = vpack.c.bf16 %v240_v16, %v238_v15  ;;  %v102_v24 = vrot.slane %v93_v21, %v101_v22  ;;  %v242_v31 = vld [vmem:[%s641_s4] sm:$0x3]  ;;  %p513_p10 = scmp.ne.s32.totalorder %s334_s8, %s512_s2  ;;  %p518_p12 = scmp.lt.s32.totalorder %s512_s2, %s512_s2 }
  0x58   :  { %v247_v32 = vrot.slane %v242_v31, %v97_v20  ;;  %v251_v33 = vrot.slane %v242_v31, %v101_v22 }
  0x59   :  { %170 = vmatmul.mubr.f32.vlgmr.msra.gmra.mrb[0].mxu0 %v60_v23  ;;  %402 = vmatpush1.bf16.msra.mxu1 %v401_v29  ;;  %v98_v23 = vrot.slane %v93_v21, %v97_v20  ;;  %p519_p13 = por %p518_p12, %p517_p11 }
  0x5a   :  { %404 = vmatprep.subr.bf16.mxu1 %v403_v30 }
  0x5b   :  { %p520_p0 = pnand %p519_p13, %p513_p10 }
  0x5d   :  { %406 = vmatpush1.bf16.msra.mxu1 %v405_v35 }
  0x5e   :  { %408 = vmatprep.subr.bf16.mxu1 %v407_v36 }
  0x61   :  { %410 = vmatpush1.bf16.msra.mxu1 %v409_v41 }
  0x62   :  { %412 = vmatprep.subr.bf16.mxu1 %v411_v42 }
  0x65   :  { %414 = vmatpush1.bf16.msra.mxu1 %v413_v47 }
  0x66   :  { %416 = vmatprep.subr.bf16.mxu1 %v415_v48 }
  0x69   :  { %418 = vmatpush1.bf16.msra.mxu1 %v417_v53 }
  0x6a   :  { %420 = vmatprep.subr.bf16.mxu1 %v419_v54 }
  0x6d   :  { %422 = vmatpush1.bf16.msra.mxu1 %v421_v59 }
  0x6e   :  { %424 = vmatprep.subr.bf16.mxu1 %v423_v60 }
  0x71   :  { %426 = vmatpush1.bf16.msra.mxu1 %v425_v1 }
  0x72   :  { %428 = vmatprep.subr.bf16.mxu1 %v427_v2 }
  0x75   :  { %430 = vmatpush1.bf16.msra.mxu1 %v429_v7 }
  0x76   :  { %432 = vmatprep.subr.bf16.mxu1 %v431_v8 }
  0x79   :  { %434 = vmatpush1.bf16.msra.mxu1 %v433_v11 }
  0x7a   :  { %436 = vmatprep.subr.bf16.mxu1 %v435_v14 }
  0x7d   :  { %438 = vmatpush1.bf16.msra.mxu1 %v437_v17 }
 0x12c   :  { %v171_v25 = vpop.f32.mrb[0].mxu0 }
 0x12d   :  { %v172_v26 = vadd.f32 %v171_v25, %v98_v23  ;;  %v173_v27 = vpop.f32.mrb[1].mxu0 }
 0x12e   :  { %v174_v28 = vadd.f32 %v173_v27, %v102_v24 }
 0x12f   :  { %v176_v30 = vmax.f32 %v172_v26, 0.0 }
 0x130   :  { %v177_v29 = vmax.f32 %v174_v28, 0.0 }
 0x132   :  { %318 = vmatprep.mubr.f32.mxu1 %v177_v29 }
 0x133   :  { %319 = vmatmul.mubr.f32.vlgmr.msra.gmra.mrb[0].mxu1 %v176_v30 }
 0x206   :  { %v320_v34 = vpop.f32.mrb[0].mxu1 }
 0x207   :  { %v321_v35 = vadd.f32 %v320_v34, %v247_v32  ;;  %v322_v36 = vpop.f32.mrb[1].mxu1 }
 0x208   :  { %v323_v37 = vadd.f32 %v322_v36, %v251_v33 }
 0x209   :  { %325 = vst [vmem:[#allocation8] sm:$0xff] %v321_v35 }
 0x20a   :  { %326 = vst [vmem:[#allocation8 + $0x8] sm:$0xff] %v323_v37 }
 0x20b   :  { %523 = shalt.err (!%p520_p0)
}
 0x20c   :  { %s524_s10 = scalar_lea.hbm %s642_s5, 256 }
 0x20d   :  { %p525_p1 = scmp.ne.s32.totalorder %s642_s5, %s524_s10  ;;  %p528_p2 = scmp.lt.u32.totalorder %s524_s10, %s642_s5 }
 0x20f   :  { %p530_p3 = pnand %p528_p2, %p525_p1 }
 0x211   :  { %533 = shalt.err (!%p530_p3)
}
 0x212   :  { %336 = dma.vmem_to_hbm [thread:$0]  %s334_s8, 256, %s642_s5, [#allocation4]  }
 0x213   :  { %538 = dma.done.wait [#allocation4], 256  }
 0x214   :  { %539 = vsyncadd [#allocation4], 4294967040 }
 0x215   :  { %340 = vsyncpa [#allocation3], 1 }
 0x216   :  { %341 = vsyncpa [#allocation6], 1 }
 0x217   :  { %342 = vsyncpa [#allocation4], 1 }

</bundles_post_ra>
